<compile_context>
chip_gen: v6e
topology: v6e:2x2x1
jax: 0.10.0
libtpu: 0.0.40
codegen_flags: <defaults>
</compile_context>

<pallas_src>
import jax
import jax.numpy as jnp
from jax.experimental import pallas as pl
from jax.experimental.pallas import tpu as pltpu


def _round_up(n, m):
    return ((n + m - 1) // m) * m


def _regression_kernel(x_ref, w_ref, b_ref, o_ref):
    # x_ref: (tm_p, zp) lane-packed activations (VMEM)
    # w_ref: (zp, pack) block-diagonal weight (VMEM, resident across the grid)
    # b_ref: (1,) bias (SMEM scalar)
    # o_ref: (tm_p, pack) output block
    x = jnp.maximum(x_ref[...], 0)                                    # ReLU on the VPU
    acc = jnp.dot(x, w_ref[...], preferred_element_type=jnp.float32)  # MXU, f32 accum
    o_ref[...] = (acc + b_ref[0]).astype(o_ref.dtype)


def ingestables_regression(z_emb, weight, bias, *, max_rows_per_step=4096):
    """out = ReLU(z_emb) @ weight + bias.

    z_emb: [..., z_dim]; weight: [z_dim, 1]; bias: [1].  Returns [..., 1] in z_emb.dtype.
    """
    *lead, z_dim = z_emb.shape
    dtype = z_emb.dtype
    x = z_emb.reshape(-1, z_dim)
    r = x.shape[0]

    # Lane packing: fold `pack` consecutive rows into one 128-lane packed row.
    pack = 128 // z_dim if (z_dim < 128 and 128 % z_dim == 0) else 1
    zp = z_dim * pack

    # Rows (original) per grid step: big tile, aligned so packed sublane dim % 8 == 0.
    row_align = pack * 8
    tm = min(_round_up(max_rows_per_step, row_align), _round_up(r, row_align))
    r_pad = _round_up(r, tm)
    grid = r_pad // tm
    tm_p = tm // pack

    if r_pad != r:
        x = jnp.pad(x, ((0, r_pad - r), (0, 0)))
    xp = x.reshape(r_pad // pack, zp)  # free, row-major contiguous reshape

    # Block-diagonal weight: w_bd[j*z_dim + d, j] = w[d].
    w = weight.reshape(z_dim).astype(dtype)
    if pack > 1:
        eye = jnp.eye(pack, dtype=dtype)
        w_bd = (eye[:, None, :] * w[None, :, None]).reshape(zp, pack)
    else:
        w_bd = w.reshape(z_dim, 1)

    b_smem = bias.reshape(1).astype(jnp.float32)

    out = pl.pallas_call(
        _regression_kernel,
        out_shape=jax.ShapeDtypeStruct((r_pad // pack, pack), dtype),
        grid_spec=pltpu.PrefetchScalarGridSpec(
            num_scalar_prefetch=0,
            grid=(grid,),
            in_specs=[
                pl.BlockSpec((tm_p, zp), lambda i: (i, 0)),
                pl.BlockSpec((zp, pack), lambda i: (0, 0)),
                pl.BlockSpec(memory_space=pltpu.MemorySpace.SMEM),
            ],
            out_specs=pl.BlockSpec((tm_p, pack), lambda i: (i, 0)),
        ),
        compiler_params=pltpu.CompilerParams(
            dimension_semantics=("parallel",)),
    )(xp, w_bd, b_smem)

    # Row-major flatten restores the original row order; drop padded rows.
    return out.reshape(r_pad)[:r].reshape(*lead, 1)


def _ref(z_emb, weight, bias):
    return jnp.maximum(z_emb, 0.0) @ weight + bias


if __name__ == "__main__":
    key = jax.random.PRNGKey(0)
    k_x, k_w, k_b, k_x2, k_x3 = jax.random.split(key, 5)

    # Small shapes consistent with the module: batch=2, num_num_feats=8, z_dim=32.
    batch, num_feats, z_dim = 2, 8, 32
    z_emb = jax.random.normal(k_x, (batch, num_feats, z_dim), dtype=jnp.float32)

    # Deterministic nn.Linear-style init: U(-1/sqrt(z_dim), 1/sqrt(z_dim)).
    bound = 1.0 / (z_dim ** 0.5)
    weight = jax.random.uniform(k_w, (z_dim, 1), minval=-bound, maxval=bound,
                                dtype=jnp.float32)
    bias = jax.random.uniform(k_b, (1,), minval=-bound, maxval=bound,
                              dtype=jnp.float32)

    out = jax.block_until_ready(ingestables_regression(z_emb, weight, bias))
    assert out.shape == (batch, num_feats, 1)
    assert jnp.allclose(out, _ref(z_emb, weight, bias), atol=1e-5, rtol=1e-5)

    # Ragged row count (R = 35, exercises the padded tail).
    z2 = jax.random.normal(k_x2, (5, 7, z_dim), dtype=jnp.float32)
    out2 = jax.block_until_ready(ingestables_regression(z2, weight, bias))
    assert out2.shape == (5, 7, 1)
    assert jnp.allclose(out2, _ref(z2, weight, bias), atol=1e-5, rtol=1e-5)

    # Multi-step grid (R = 1000 with a 256-row tile -> 4 grid steps).
    z3 = jax.random.normal(k_x3, (4, 250, z_dim), dtype=jnp.float32)
    out3 = jax.block_until_ready(
        ingestables_regression(z3, weight, bias, max_rows_per_step=256))
    assert out3.shape == (4, 250, 1)
    assert jnp.allclose(out3, _ref(z3, weight, bias), atol=1e-5, rtol=1e-5)

    print("KERNEL_OK")
</pallas_src>

<mosaic_0001>
module attributes {stable_mosaic.version = 11 : i64} {
  func.func @_regression_kernel(%arg0: i32, %arg1: memref<8x128xf32, #tpu.memory_space<vmem>>, %arg2: memref<128x4xf32, #tpu.memory_space<vmem>>, %arg3: memref<1xf32, #tpu.memory_space<smem>>, %arg4: memref<8x4xf32, #tpu.memory_space<vmem>>) attributes {dimension_semantics = [#tpu.dimension_semantics<parallel>], iteration_bounds = array<i64: 1>, scalar_prefetch = 0 : i64, scratch_operands = 0 : i64, tpu.core_type = #tpu.core_type<tc>, window_params = [{transform_indices = @transform_0, window_bounds = array<i64: 8, 128>}, {pipeline_mode = #tpu.pipeline_mode<synchronous>, transform_indices = @transform_1, window_bounds = array<i64: 128, 4>}, {transform_indices = @transform_2, window_bounds = array<i64: 1>}, {transform_indices = @transform_3, window_bounds = array<i64: 8, 4>}]} {
    %c0 = arith.constant 0 : index
    %c0_0 = arith.constant 0 : index
    %0 = vector.load %arg1[%c0, %c0_0] : memref<8x128xf32, #tpu.memory_space<vmem>>, vector<8x128xf32>
    %cst = arith.constant 0.000000e+00 : f32
    %1 = vector.broadcast %cst : f32 to vector<8x128xf32>
    %2 = arith.maximumf %0, %1 : vector<8x128xf32>
    %c0_1 = arith.constant 0 : index
    %c0_2 = arith.constant 0 : index
    %3 = vector.load %arg2[%c0_1, %c0_2] : memref<128x4xf32, #tpu.memory_space<vmem>>, vector<128x4xf32>
    %cst_3 = arith.constant dense<0.000000e+00> : vector<8x4xf32>
    %4 = tpu.matmul %2, %3, %cst_3 {dimension_numbers = #tpu.dot_dimension_numbers<[1], [0], [0], [1], [0, 0, 1, 1], [], []>} : vector<8x128xf32>, vector<128x4xf32>, vector<8x4xf32> -> vector<8x4xf32>
    %c0_4 = arith.constant 0 : index
    %5 = memref.load %arg3[%c0_4] : memref<1xf32, #tpu.memory_space<smem>>
    %6 = vector.broadcast %5 : f32 to vector<8x4xf32>
    %7 = arith.addf %4, %6 : vector<8x4xf32>
    %c0_5 = arith.constant 0 : index
    %c0_6 = arith.constant 0 : index
    %8 = vector.load %arg4[%c0_5, %c0_6] : memref<8x4xf32, #tpu.memory_space<vmem>>, vector<8x4xf32>
    tpu.vector_store %arg4[%c0_5, %c0_6], %7 {strides = array<i32>} : memref<8x4xf32, #tpu.memory_space<vmem>>, vector<8x4xf32>,
    return
  }
  func.func @transform_0(%arg0: i32) -> (i32, i32) {
    %c0_i32 = arith.constant 0 : i32
    %c0_i32_0 = arith.constant 0 : i32
    return %arg0, %c0_i32 : i32, i32
  }
  func.func @transform_1(%arg0: i32) -> (i32, i32) {
    %c0_i32 = arith.constant 0 : i32
    %c0_i32_0 = arith.constant 0 : i32
    %c0_i32_1 = arith.constant 0 : i32
    return %c0_i32, %c0_i32_0 : i32, i32
  }
  func.func @transform_2(%arg0: i32) -> i32 {
    %c0_i32 = arith.constant 0 : i32
    %c0_i32_0 = arith.constant 0 : i32
    return %c0_i32 : i32
  }
  func.func @transform_3(%arg0: i32) -> (i32, i32) {
    %c0_i32 = arith.constant 0 : i32
    %c0_i32_0 = arith.constant 0 : i32
    return %arg0, %c0_i32 : i32, i32
  }
}

</mosaic_0001>

<bundles_post_ra>
// kernel: tpu_custom_call.1
= control target key start
LH: loop header
LB: loop body
LE: loop exit
PB: predicated region body
PF: predicated region fallthrough
CT: control target
= control target key end

     0   :  { %v165_v0 = vmov 0.0   ;;  %vm166_vm0 = vmmov 0   ;;  %vm105_vm1 = vcmask 31744   ;;  %s244_s1 = inlined_call_operand.vmem [shape: f32[128,4], index: 1, kind: input, shape index: {}]   ;;  %s245_s0 = inlined_call_operand.vmem [shape: f32[8,128], index: 0, kind: input, shape index: {}]   ;;  %s246_s2 = inlined_call_operand.<no memory space> [shape: f32[1], index: 2, kind: input, shape index: {}]   ;;  %s247_s3 = inlined_call_operand.vmem [shape: f32[8,4], index: 3, kind: output, shape index: {}]  }
   0x1   :  { %128 = vmatprep.subr.mxu0 %v165_v0  ;;  %v32_v1 = vld [vmem:[%s244_s1 + $0x78] sm:$0xff]  ;;  %v31_v2 = vld [vmem:[%s244_s1 + $0x70] sm:$0xff]  ;;  %160 = vmatprep.mubr.msk.f32.mxu0 %vm166_vm0, %v165_v0  ;;  %v30_v3 = vld [vmem:[%s244_s1 + $0x68] sm:$0xff]  ;;  %v34_v19 = vstv %s246_s2 }
   0x2   :  { %129 = vmatpush3.msra.mxu0 %v32_v1  ;;  %v29_v4 = vld [vmem:[%s244_s1 + $0x60] sm:$0xff]  ;;  %v28_v5 = vld [vmem:[%s244_s1 + $0x58] sm:$0xff]  ;;  %v27_v6 = vld [vmem:[%s244_s1 + $0x50] sm:$0xff] }
   0x3   :  { %130 = vmatprep.subr.mxu0 %v165_v0  ;;  %v26_v7 = vld [vmem:[%s244_s1 + $0x48] sm:$0xff]  ;;  %v25_v8 = vld [vmem:[%s244_s1 + $0x40] sm:$0xff]  ;;  %v24_v9 = vld [vmem:[%s244_s1 + $0x38] sm:$0xff] }
   0x4   :  { %131 = vmatpush3.msra.mxu0 %v31_v2  ;;  %v23_v10 = vld [vmem:[%s244_s1 + $0x30] sm:$0xff]  ;;  %v22_v11 = vld [vmem:[%s244_s1 + $0x28] sm:$0xff]  ;;  %v21_v12 = vld [vmem:[%s244_s1 + $0x20] sm:$0xff] }
   0x5   :  { %132 = vmatprep.subr.mxu0 %v165_v0  ;;  %v20_v13 = vld [vmem:[%s244_s1 + $0x18] sm:$0xff]  ;;  %v19_v14 = vld [vmem:[%s244_s1 + $0x10] sm:$0xff]  ;;  %v15_v15 = vld [vmem:[%s245_s0] sm:$0xff] }
   0x6   :  { %133 = vmatpush3.msra.mxu0 %v30_v3  ;;  %v18_v16 = vld [vmem:[%s244_s1 + $0x8] sm:$0xff]  ;;  %v17_v17 = vld [vmem:[%s244_s1] sm:$0xff]  ;;  %v16_v18 = vmax.f32 %v15_v15, 0.0 }
   0x7   :  { %134 = vmatprep.subr.mxu0 %v165_v0 }
   0x8   :  { %135 = vmatpush3.msra.mxu0 %v29_v4 }
   0x9   :  { %136 = vmatprep.subr.mxu0 %v165_v0 }
   0xa   :  { %137 = vmatpush3.msra.mxu0 %v28_v5 }
   0xb   :  { %138 = vmatprep.subr.mxu0 %v165_v0 }
   0xc   :  { %139 = vmatpush3.msra.mxu0 %v27_v6 }
   0xd   :  { %140 = vmatprep.subr.mxu0 %v165_v0 }
   0xe   :  { %141 = vmatpush3.msra.mxu0 %v26_v7 }
   0xf   :  { %142 = vmatprep.subr.mxu0 %v165_v0 }
  0x10   :  { %143 = vmatpush3.msra.mxu0 %v25_v8 }
  0x11   :  { %144 = vmatprep.subr.mxu0 %v165_v0 }
  0x12   :  { %145 = vmatpush3.msra.mxu0 %v24_v9 }
  0x13   :  { %146 = vmatprep.subr.mxu0 %v165_v0 }
  0x14   :  { %147 = vmatpush3.msra.mxu0 %v23_v10 }
  0x15   :  { %148 = vmatprep.subr.mxu0 %v165_v0 }
  0x16   :  { %149 = vmatpush3.msra.mxu0 %v22_v11 }
  0x17   :  { %150 = vmatprep.subr.mxu0 %v165_v0 }
  0x18   :  { %151 = vmatpush3.msra.mxu0 %v21_v12 }
  0x19   :  { %152 = vmatprep.subr.mxu0 %v165_v0 }
  0x1a   :  { %153 = vmatpush3.msra.mxu0 %v20_v13 }
  0x1b   :  { %154 = vmatprep.subr.mxu0 %v165_v0 }
  0x1c   :  { %155 = vmatpush3.msra.mxu0 %v19_v14 }
  0x1d   :  { %156 = vmatprep.subr.mxu0 %v165_v0 }
  0x1e   :  { %157 = vmatpush3.msra.mxu0 %v18_v16 }
  0x1f   :  { %158 = vmatprep.subr.mxu0 %v165_v0 }
  0x20   :  { %159 = vmatpush3.msra.mxu0 %v17_v17 }
  0x21   :  { %161 = vmatmul.mubr.f32.vlgmr.msra.gmra.mxu0 %v16_v18 }
  0xe1   :  { %v101_v20 = vpop.f32.mrf.mxu0 }
  0xe2   :  { %v102_v21 = vadd.f32 %v101_v20, %v34_v19 }
  0xe3   :  { %v162_v22 = vpop.f32.mrf.mxu0 }
  0xe4   :  { %106 = vst.msk [vmem:[%s247_s3] sm:$0xff] %vm105_vm1, %v102_v21 }

</bundles_post_ra>
